<compile_context>
chip_gen: v7x
topology: tpu7x:2x2x1
jax: 0.10.0
libtpu: 0.0.40
codegen_flags: <defaults>
</compile_context>

<pallas_src>
import functools
import numpy as np
import jax
import jax.numpy as jnp
from jax.experimental import pallas as pl
from jax.experimental.pallas import tpu as pltpu

PAD = 0  # Constants.PAD


# --------------------------- chip-aware tiling -------------------------------

def _query_vmem_capacity():
    try:
        return int(pltpu.get_tpu_info().vmem_capacity_bytes)
    except Exception:
        return 64 * 1024 * 1024        # conservative (v7x per-TC VMEM)


_VMEM_CAP = _query_vmem_capacity()
_VMEM_LIMIT = int(min(96 * 1024 * 1024,
                      max(32 * 1024 * 1024, (_VMEM_CAP * 3) // 4)))
_BIG_VMEM = _VMEM_CAP >= 100 * 1024 * 1024     # v5e / v6e (128 MiB) vs v7x (64 MiB)
_TM = 512 if _BIG_VMEM else 256
_TN = 512 if _BIG_VMEM else 256
_TK = 512


def _tile(dim, target, align):
    """Largest tile <= target that divides `dim` and is a multiple of `align`.

    Falls back to the full dimension for small/odd sizes (e.g. the demo
    shapes below).
    """
    if dim <= target:
        return dim
    if dim % target == 0:
        return target
    t = (target // align) * align
    while t >= align:
        if dim % t == 0:
            return t
        t -= align
    # TODO(synk): pad M/N to tile multiples (cdiv grid + masked epilogue)
    # instead of the full-dim fallback so odd production sizes never request
    # an oversized f32 accumulator on v7x.
    return dim


# ------------------------------ Pallas kernels -------------------------------

def _linear_kernel(x_ref, w_ref, b_ref, o_ref, acc_ref, *, relu):
    """Tiled y = x @ w + b (optional ReLU); K-reduction f32 accumulator."""
    k = pl.program_id(2)

    @pl.when(k == 0)
    def _init():
        acc_ref[...] = jnp.zeros_like(acc_ref)

    acc_ref[...] += jnp.dot(x_ref[...], w_ref[...],
                            preferred_element_type=jnp.float32)

    @pl.when(k == pl.num_programs(2) - 1)
    def _fin():
        y = acc_ref[...] + b_ref[...]
        if relu:
            y = jnp.maximum(y, 0.0)
        o_ref[...] = y.astype(o_ref.dtype)


def _linear_res_ln_kernel(x_ref, w_ref, b_ref, res_ref, g_ref, bt_ref, np_ref,
                          o_ref, acc_ref):
    """Fused: (x @ w) + bias + residual -> LayerNorm -> * non_pad, tiled M/K."""
    k = pl.program_id(1)

    @pl.when(k == 0)
    def _init():
        acc_ref[...] = jnp.zeros_like(acc_ref)

    acc_ref[...] += jnp.dot(x_ref[...], w_ref[...],
                            preferred_element_type=jnp.float32)

    @pl.when(k == pl.num_programs(1) - 1)
    def _fin():
        y = acc_ref[...] + b_ref[...] + res_ref[...].astype(jnp.float32)
        mu = jnp.mean(y, axis=-1, keepdims=True)
        var = jnp.mean((y - mu) ** 2, axis=-1, keepdims=True)   # biased (torch)
        y = (y - mu) * jax.lax.rsqrt(var + 1e-5) * g_ref[...] + bt_ref[...]
        y = y * np_ref[...]                 # fused non-pad zeroing, (tm,1) bcast
        o_ref[...] = y.astype(o_ref.dtype)


def _attn_head(q, k, v, bias):
    """Single-head scaled-dot attention (1/temperature pre-folded into Q)."""
    s = jax.lax.dot_general(q, k, (((1,), (1,)), ((), ())),
                            preferred_element_type=jnp.float32)
    s = s + bias
    s = s - jnp.max(s, axis=-1, keepdims=True)
    p = jnp.exp(s)
    p = p * pl.reciprocal(jnp.sum(p, axis=-1, keepdims=True), approx=True)
    return jnp.dot(p.astype(v.dtype), v, preferred_element_type=jnp.float32)


def _self_attn_kernel(kp_ref, qkv_ref, o_ref, *, n_head, d_k, d_v, causal):
    """All heads of self-attention for one batch element.

    qkv_ref block: (1, L, H*Dk | H*Dk | H*Dv) merged projection — heads are
    carved out with static lane slices (no HBM transposes).  The key-pad mask
    arrives as a (1, 1, L) row; the causal triangle is generated in-kernel.
    Output is written directly in merged (1, L, H*Dv) layout (lane-dense).
    """
    L = qkv_ref.shape[1]
    bias = kp_ref[0] * (-1e9)                        # (1, L) -> bcast over rows
    if causal:
        row = jax.lax.broadcasted_iota(jnp.int32, (L, L), 0)
        col = jax.lax.broadcasted_iota(jnp.int32, (L, L), 1)
        bias = bias + jnp.where(col > row, jnp.float32(-1e9), jnp.float32(0.0))
    ko = n_head * d_k
    vo = 2 * n_head * d_k
    for h in range(n_head):
        q = qkv_ref[0, :, h * d_k:(h + 1) * d_k]
        k = qkv_ref[0, :, ko + h * d_k:ko + (h + 1) * d_k]
        v = qkv_ref[0, :, vo + h * d_v:vo + (h + 1) * d_v]
        ctx = _attn_head(q, k, v, bias)
        o_ref[0, :, h * d_v:(h + 1) * d_v] = ctx.astype(o_ref.dtype)


def _cross_attn_kernel(kp_ref, q_ref, kv_ref, o_ref, *, n_head, d_k, d_v):
    """All heads of cross-attention for one batch element (Q from decoder,
    merged K|V projection of the encoder memory)."""
    bias = kp_ref[0] * (-1e9)                        # (1, Lk)
    vo = n_head * d_k
    for h in range(n_head):
        q = q_ref[0, :, h * d_k:(h + 1) * d_k]
        k = kv_ref[0, :, h * d_k:(h + 1) * d_k]
        v = kv_ref[0, :, vo + h * d_v:vo + (h + 1) * d_v]
        ctx = _attn_head(q, k, v, bias)
        o_ref[0, :, h * d_v:(h + 1) * d_v] = ctx.astype(o_ref.dtype)


# ------------------------------ kernel wrappers -------------------------------

def linear(x2d, w, b, relu=False, out_dtype=jnp.bfloat16):
    """x2d (M,K) bf16 @ w (K,N) bf16 + b (1,N) f32 -> (M,N) bf16, tiled."""
    M, K = x2d.shape
    N = w.shape[1]
    tm = _tile(M, _TM, 8)
    tn = _tile(N, _TN, 128)
    tk = _tile(K, _TK, 128)
    grid = (M // tm, N // tn, K // tk)
    return pl.pallas_call(
        functools.partial(_linear_kernel, relu=relu),
        out_shape=jax.ShapeDtypeStruct((M, N), out_dtype),
        grid=grid,
        in_specs=[pl.BlockSpec((tm, tk), lambda i, j, k: (i, k)),
                  pl.BlockSpec((tk, tn), lambda i, j, k: (k, j)),
                  pl.BlockSpec((1, tn), lambda i, j, k: (0, j))],
        out_specs=pl.BlockSpec((tm, tn), lambda i, j, k: (i, j)),
        scratch_shapes=[pltpu.VMEM((tm, tn), jnp.float32)],
        compiler_params=pltpu.CompilerParams(
            dimension_semantics=("parallel", "parallel", "arbitrary"),
            vmem_limit_bytes=_VMEM_LIMIT),
    )(x2d, w, b)


def linear_res_ln(x2d, w, b, residual, gamma, beta, non_pad):
    """Fused (x @ w + b + residual) -> LayerNorm -> * non_pad; bf16 out."""
    M, K = x2d.shape
    D = w.shape[1]
    tm = _tile(M, _TM, 8)
    tk = _tile(K, _TK, 128)
    grid = (M // tm, K // tk)
    return pl.pallas_call(
        _linear_res_ln_kernel,
        out_shape=jax.ShapeDtypeStruct((M, D), jnp.bfloat16),
        grid=grid,
        in_specs=[pl.BlockSpec((tm, tk), lambda i, k: (i, k)),
                  pl.BlockSpec((tk, D), lambda i, k: (k, 0)),
                  pl.BlockSpec((1, D), lambda i, k: (0, 0)),
                  pl.BlockSpec((tm, D), lambda i, k: (i, 0)),
                  pl.BlockSpec((1, D), lambda i, k: (0, 0)),
                  pl.BlockSpec((1, D), lambda i, k: (0, 0)),
                  pl.BlockSpec((tm, 1), lambda i, k: (i, 0))],
        out_specs=pl.BlockSpec((tm, D), lambda i, k: (i, 0)),
        scratch_shapes=[pltpu.VMEM((tm, D), jnp.float32)],
        compiler_params=pltpu.CompilerParams(
            dimension_semantics=("parallel", "arbitrary"),
            vmem_limit_bytes=_VMEM_LIMIT),
    )(x2d, w, b, residual, gamma, beta, non_pad)


def self_attn_context(qkv3, key_pad, n_head, d_k, d_v, causal):
    """qkv3 (B, L, H*(2Dk+Dv)) bf16, key_pad (B, 1, L) f32 -> (B, L, H*Dv)."""
    B, L, C = qkv3.shape
    return pl.pallas_call(
        functools.partial(_self_attn_kernel, n_head=n_head, d_k=d_k, d_v=d_v,
                          causal=causal),
        out_shape=jax.ShapeDtypeStruct((B, L, n_head * d_v), jnp.bfloat16),
        grid=(B,),
        in_specs=[pl.BlockSpec((1, 1, L), lambda b: (b, 0, 0)),
                  pl.BlockSpec((1, L, C), lambda b: (b, 0, 0))],
        out_specs=pl.BlockSpec((1, L, n_head * d_v), lambda b: (b, 0, 0)),
        compiler_params=pltpu.CompilerParams(
            dimension_semantics=("parallel",),
            vmem_limit_bytes=_VMEM_LIMIT),
    )(key_pad, qkv3)


def cross_attn_context(q3, kv3, key_pad, n_head, d_k, d_v):
    """q3 (B, Lq, H*Dk), kv3 (B, Lk, H*(Dk+Dv)), key_pad (B, 1, Lk)."""
    B, Lq, Cq = q3.shape
    Lk, Ck = kv3.shape[1], kv3.shape[2]
    return pl.pallas_call(
        functools.partial(_cross_attn_kernel, n_head=n_head, d_k=d_k, d_v=d_v),
        out_shape=jax.ShapeDtypeStruct((B, Lq, n_head * d_v), jnp.bfloat16),
        grid=(B,),
        in_specs=[pl.BlockSpec((1, 1, Lk), lambda b: (b, 0, 0)),
                  pl.BlockSpec((1, Lq, Cq), lambda b: (b, 0, 0)),
                  pl.BlockSpec((1, Lk, Ck), lambda b: (b, 0, 0))],
        out_specs=pl.BlockSpec((1, Lq, n_head * d_v), lambda b: (b, 0, 0)),
        compiler_params=pltpu.CompilerParams(
            dimension_semantics=("parallel",),
            vmem_limit_bytes=_VMEM_LIMIT),
    )(key_pad, q3, kv3)


# ------------------------------ model pieces ---------------------------------

def get_sinusoid_encoding_table(n_position, d_hid, padding_idx=None):
    def cal_angle(position, hid_idx):
        return position / np.power(10000, 2 * (hid_idx // 2) / d_hid)
    table = np.array([[cal_angle(p, j) for j in range(d_hid)]
                      for p in range(n_position)], dtype=np.float64)
    table[:, 0::2] = np.sin(table[:, 0::2])
    table[:, 1::2] = np.cos(table[:, 1::2])
    if padding_idx is not None:
        table[padding_idx] = 0.0
    return jnp.asarray(table, dtype=jnp.float32)


def self_attention(p, x3, key_pad, non_pad, causal):
    B, L, D = x3.shape
    H, Dk, Dv = p["n_head"], p["d_k"], p["d_v"]
    res2 = x3.reshape(B * L, D)
    qkv = linear(res2, p["w_qkv"], p["b_qkv"])          # fused Q|K|V projection
    qkv3 = qkv.reshape(B, L, H * (2 * Dk + Dv))         # free reshape, no transpose
    ctx2 = self_attn_context(qkv3, key_pad, H, Dk, Dv, causal).reshape(B * L, H * Dv)
    out = linear_res_ln(ctx2, p["w_fc"], p["b_fc"], res2,
                        p["ln_g"], p["ln_b"], non_pad)
    return out.reshape(B, L, D)


def cross_attention(p, x3, mem3, key_pad, non_pad):
    B, Lq, D = x3.shape
    Lk = mem3.shape[1]
    H, Dk, Dv = p["n_head"], p["d_k"], p["d_v"]
    res2 = x3.reshape(B * Lq, D)
    q3 = linear(res2, p["w_q"], p["b_q"]).reshape(B, Lq, H * Dk)
    kv3 = linear(mem3.reshape(B * Lk, D), p["w_kv"],
                 p["b_kv"]).reshape(B, Lk, H * (Dk + Dv))   # fused K|V
    ctx2 = cross_attn_context(q3, kv3, key_pad, H, Dk, Dv).reshape(B * Lq, H * Dv)
    out = linear_res_ln(ctx2, p["w_fc"], p["b_fc"], res2,
                        p["ln_g"], p["ln_b"], non_pad)
    return out.reshape(B, Lq, D)


def pos_ffn(p, x3, non_pad):
    B, L, D = x3.shape
    res2 = x3.reshape(B * L, D)
    h = linear(res2, p["w1"], p["b1"], relu=True)
    out = linear_res_ln(h, p["w2"], p["b2"], res2, p["ln_g"], p["ln_b"], non_pad)
    return out.reshape(B, L, D)


def transformer_forward(params, src_seq, src_pos, tag_seq, tag_pos):
    # Transformer.forward
    tag_seq = tag_seq[:, :-1]
    tag_pos = tag_pos[:, :-1]
    B, Ls = src_seq.shape
    Lt = tag_seq.shape[1]

    # Masks (no dense (B, Lq, Lk) tensors are materialized):
    src_keypad = (src_seq == PAD).astype(jnp.float32)[:, None, :]   # (B,1,Ls)
    tgt_keypad = (tag_seq == PAD).astype(jnp.float32)[:, None, :]   # (B,1,Lt)
    src_nonpad = (src_seq != PAD).astype(jnp.float32).reshape(B * Ls, 1)
    tgt_nonpad = (tag_seq != PAD).astype(jnp.float32).reshape(B * Lt, 1)

    # ----- Encoder -----
    # TODO(synk): embedding / positional lookups stay as XLA gathers.
    enc = params["emb"][src_seq] + params["pos_table"][src_pos]     # bf16
    for lp in params["enc_layers"]:
        enc = self_attention(lp["slf"], enc, src_keypad, src_nonpad, causal=False)
        enc = pos_ffn(lp["ffn"], enc, src_nonpad)

    # ----- Decoder -----
    dec = params["emb"][tag_seq] + params["pos_table"][tag_pos]     # bf16
    for lp in params["dec_layers"]:
        dec = self_attention(lp["slf"], dec, tgt_keypad, tgt_nonpad, causal=True)
        dec = cross_attention(lp["enc"], dec, enc, src_keypad, tgt_nonpad)
        dec = pos_ffn(lp["ffn"], dec, tgt_nonpad)

    # ----- Output projection (shared tgt embedding, x_logit_scale folded in) -
    # TODO(synk): at production vocab sizes, pad n_vocab to a multiple of 128
    # for lane-dense stores and slice the logits afterwards.
    D = dec.shape[2]
    logits = linear(dec.reshape(B * Lt, D), params["proj_w"], params["proj_b"])
    return logits  # (B*(Ltag-1), n_vocab), bf16 — seq_logit.view(-1, vocab)


# ------------------------------ parameter init --------------------------------

def init_params(key, n_vocab, len_max_seq, d_model, d_inner,
                n_layers, n_head, d_k, d_v):
    keys = iter(jax.random.split(key, 1024))

    def nrm(shape, std=0.05):
        return jax.random.normal(next(keys), shape, jnp.float32) * std

    def bias(n):
        return nrm((1, n))                      # biases pre-shaped (1, N) f32

    emb_f32 = nrm((n_vocab, d_model), std=1.0 / np.sqrt(d_model))
    emb_f32 = emb_f32.at[PAD].set(0.0)          # padding_idx=PAD row is zero
    pos_table = get_sinusoid_encoding_table(len_max_seq + 1, d_model,
                                            padding_idx=0)
    temperature = float(np.sqrt(d_k))

    def mha(self_attn):
        w_qs = nrm((d_model, n_head * d_k)) / temperature   # fold 1/temperature
        b_qs = bias(n_head * d_k) / temperature
        w_ks, b_ks = nrm((d_model, n_head * d_k)), bias(n_head * d_k)
        w_vs, b_vs = nrm((d_model, n_head * d_v)), bias(n_head * d_v)
        p = dict(n_head=n_head, d_k=d_k, d_v=d_v,
                 w_fc=nrm((n_head * d_v, d_model)).astype(jnp.bfloat16),
                 b_fc=bias(d_model),
                 ln_g=jnp.ones((1, d_model), jnp.float32),
                 ln_b=jnp.zeros((1, d_model), jnp.float32))
        if self_attn:
            p["w_qkv"] = jnp.concatenate([w_qs, w_ks, w_vs],
                                         axis=1).astype(jnp.bfloat16)
            p["b_qkv"] = jnp.concatenate([b_qs, b_ks, b_vs], axis=1)
        else:
            p["w_q"] = w_qs.astype(jnp.bfloat16)
            p["b_q"] = b_qs
            p["w_kv"] = jnp.concatenate([w_ks, w_vs], axis=1).astype(jnp.bfloat16)
            p["b_kv"] = jnp.concatenate([b_ks, b_vs], axis=1)
        return p

    def ffn():
        return dict(w1=nrm((d_model, d_inner)).astype(jnp.bfloat16),
                    b1=bias(d_inner),
                    w2=nrm((d_inner, d_model)).astype(jnp.bfloat16),
                    b2=bias(d_model),
                    ln_g=jnp.ones((1, d_model), jnp.float32),
                    ln_b=jnp.zeros((1, d_model), jnp.float32))

    enc_layers = [dict(slf=mha(True), ffn=ffn()) for _ in range(n_layers)]
    dec_layers = [dict(slf=mha(True), enc=mha(False), ffn=ffn())
                  for _ in range(n_layers)]

    # weight-shared output projection: pre-transpose once, fold x_logit_scale.
    proj_w = (emb_f32 * (d_model ** -0.5)).T.astype(jnp.bfloat16)
    proj_b = jnp.zeros((1, n_vocab), jnp.float32)

    return dict(emb=emb_f32.astype(jnp.bfloat16),
                pos_table=pos_table.astype(jnp.bfloat16),
                enc_layers=enc_layers, dec_layers=dec_layers,
                proj_w=proj_w, proj_b=proj_b)


# ----------------------------------- main --------------------------------------

if __name__ == "__main__":
    n_vocab = 16          # shared src/tgt vocab (weight sharing requires equality)
    len_max_seq = 8
    d_model = 32
    d_inner = 64
    n_layers = 2
    n_head = 2
    d_k = d_v = 16
    batch = 2
    seq_len = 8

    key = jax.random.PRNGKey(0)
    k_p, k_src, k_tag = jax.random.split(key, 3)

    params = init_params(k_p, n_vocab, len_max_seq, d_model, d_inner,
                         n_layers, n_head, d_k, d_v)

    src_seq = jax.random.randint(k_src, (batch, seq_len), 1, n_vocab,
                                 dtype=jnp.int32)
    tag_seq = jax.random.randint(k_tag, (batch, seq_len), 1, n_vocab,
                                 dtype=jnp.int32)
    src_pos = jnp.tile(jnp.arange(1, seq_len + 1, dtype=jnp.int32)[None],
                       (batch, 1))
    tag_pos = jnp.tile(jnp.arange(1, seq_len + 1, dtype=jnp.int32)[None],
                       (batch, 1))

    logits = transformer_forward(params, src_seq, src_pos, tag_seq, tag_pos)
    logits = jax.block_until_ready(logits)

    expected_shape = (batch * (seq_len - 1), n_vocab)
    assert logits.shape == expected_shape, (logits.shape, expected_shape)
    assert bool(jnp.all(jnp.isfinite(logits.astype(jnp.float32))))
    print("KERNEL_OK")
</pallas_src>

<mosaic_0001>
module attributes {stable_mosaic.version = 11 : i64} {
  func.func @_linear_kernel(%arg0: i32, %arg1: i32, %arg2: i32, %arg3: memref<16x32xbf16, #tpu.memory_space<vmem>>, %arg4: memref<32x96xbf16, #tpu.memory_space<vmem>>, %arg5: memref<1x96xf32, #tpu.memory_space<vmem>>, %arg6: memref<16x96xbf16, #tpu.memory_space<vmem>>, %arg7: memref<16x96xf32, #tpu.memory_space<vmem>>) attributes {dimension_semantics = [#tpu.dimension_semantics<parallel>, #tpu.dimension_semantics<parallel>, #tpu.dimension_semantics<arbitrary>], iteration_bounds = array<i64: 1, 1, 1>, scalar_prefetch = 0 : i64, scratch_operands = 1 : i64, tpu.core_type = #tpu.core_type<tc>, window_params = [{transform_indices = @transform_0, window_bounds = array<i64: 16, 32>}, {transform_indices = @transform_1, window_bounds = array<i64: 32, 96>}, {transform_indices = @transform_2, window_bounds = array<i64: 1, 96>}, {transform_indices = @transform_3, window_bounds = array<i64: 16, 96>}]} {
    %c0_i32 = arith.constant 0 : i32
    %0 = arith.cmpi eq, %arg2, %c0_i32 : i32
    %1 = arith.extui %0 : i1 to i32
    %c0_i32_0 = arith.constant 0 : i32
    %2 = arith.cmpi ne, %1, %c0_i32_0 : i32
    scf.if %2 {
      %cst_10 = arith.constant 0.000000e+00 : f32
      %12 = vector.broadcast %cst_10 : f32 to vector<16x96xf32>
      %c0_11 = arith.constant 0 : index
      %c0_12 = arith.constant 0 : index
      %13 = vector.load %arg7[%c0_11, %c0_12] : memref<16x96xf32, #tpu.memory_space<vmem>>, vector<16x96xf32>
      tpu.vector_store %arg7[%c0_11, %c0_12], %12 {strides = array<i32>} : memref<16x96xf32, #tpu.memory_space<vmem>>, vector<16x96xf32>,
    } else {
    }
    %c0 = arith.constant 0 : index
    %c0_1 = arith.constant 0 : index
    %3 = vector.load %arg7[%c0, %c0_1] : memref<16x96xf32, #tpu.memory_space<vmem>>, vector<16x96xf32>
    %c0_2 = arith.constant 0 : index
    %c0_3 = arith.constant 0 : index
    %4 = vector.load %arg3[%c0_2, %c0_3] : memref<16x32xbf16, #tpu.memory_space<vmem>>, vector<16x32xbf16>
    %c0_4 = arith.constant 0 : index
    %c0_5 = arith.constant 0 : index
    %5 = vector.load %arg4[%c0_4, %c0_5] : memref<32x96xbf16, #tpu.memory_space<vmem>>, vector<32x96xbf16>
    %cst = arith.constant dense<0.000000e+00> : vector<16x96xf32>
    %6 = tpu.matmul %4, %5, %cst {dimension_numbers = #tpu.dot_dimension_numbers<[1], [0], [0], [1], [0, 0, 1, 1], [], []>} : vector<16x32xbf16>, vector<32x96xbf16>, vector<16x96xf32> -> vector<16x96xf32>
    %7 = arith.addf %3, %6 : vector<16x96xf32>
    %c0_6 = arith.constant 0 : index
    %c0_7 = arith.constant 0 : index
    %8 = vector.load %arg7[%c0_6, %c0_7] : memref<16x96xf32, #tpu.memory_space<vmem>>, vector<16x96xf32>
    tpu.vector_store %arg7[%c0_6, %c0_7], %7 {strides = array<i32>} : memref<16x96xf32, #tpu.memory_space<vmem>>, vector<16x96xf32>,
    %c0_i32_8 = arith.constant 0 : i32
    %9 = arith.cmpi eq, %arg2, %c0_i32_8 : i32
    %10 = arith.extui %9 : i1 to i32
    %c0_i32_9 = arith.constant 0 : i32
    %11 = arith.cmpi ne, %10, %c0_i32_9 : i32
    scf.if %11 {
      %c0_10 = arith.constant 0 : index
      %c0_11 = arith.constant 0 : index
      %12 = vector.load %arg7[%c0_10, %c0_11] : memref<16x96xf32, #tpu.memory_space<vmem>>, vector<16x96xf32>
      %c0_12 = arith.constant 0 : index
      %c0_13 = arith.constant 0 : index
      %13 = vector.load %arg5[%c0_12, %c0_13] : memref<1x96xf32, #tpu.memory_space<vmem>>, vector<1x96xf32>
      %14 = vector.broadcast %13 : vector<1x96xf32> to vector<16x96xf32>
      %15 = arith.addf %12, %14 : vector<16x96xf32>
      %16 = arith.truncf %15 : vector<16x96xf32> to vector<16x96xbf16>
      %c0_14 = arith.constant 0 : index
      %c0_15 = arith.constant 0 : index
      %17 = vector.load %arg6[%c0_14, %c0_15] : memref<16x96xbf16, #tpu.memory_space<vmem>>, vector<16x96xbf16>
      tpu.vector_store %arg6[%c0_14, %c0_15], %16 {strides = array<i32>} : memref<16x96xbf16, #tpu.memory_space<vmem>>, vector<16x96xbf16>,
    } else {
    }
    return
  }
  func.func @transform_0(%arg0: i32, %arg1: i32, %arg2: i32) -> (i32, i32) {
    %c0_i32 = arith.constant 0 : i32
    return %arg0, %arg2 : i32, i32
  }
  func.func @transform_1(%arg0: i32, %arg1: i32, %arg2: i32) -> (i32, i32) {
    %c0_i32 = arith.constant 0 : i32
    return %arg2, %arg1 : i32, i32
  }
  func.func @transform_2(%arg0: i32, %arg1: i32, %arg2: i32) -> (i32, i32) {
    %c0_i32 = arith.constant 0 : i32
    %c0_i32_0 = arith.constant 0 : i32
    return %c0_i32, %arg1 : i32, i32
  }
  func.func @transform_3(%arg0: i32, %arg1: i32, %arg2: i32) -> (i32, i32) {
    %c0_i32 = arith.constant 0 : i32
    return %arg0, %arg1 : i32, i32
  }
}

</mosaic_0001>

<bundles_post_ra>
// kernel: tpu_custom_call.1
= control target key start
LH: loop header
LB: loop body
LE: loop exit
PB: predicated region body
PF: predicated region fallthrough
CT: control target
= control target key end

     0   :  { %8 = vsyncpa [#allocation4], 0  ;;  %s350_s0 = inlined_call_operand.hbm [shape: bf16[16,32], index: 0, kind: input, shape index: {}]   ;;  %s351_s1 = inlined_call_operand.hbm [shape: bf16[32,96], index: 1, kind: input, shape index: {}]   ;;  %s352_s2 = inlined_call_operand.vmem [shape: f32[1,96], index: 2, kind: input, shape index: {}]   ;;  %s353_s3 = inlined_call_operand.hbm [shape: bf16[16,96], index: 3, kind: output, shape index: {}]  }
   0x1   :  { %9 = vsyncpa [#allocation7], 0 }
   0x2   :  { %10 = vsyncpa [#allocation5], 0  ;;  %s271_s12 = smov [#allocation3]   ;;  %s199_s16 = scalar_lea.hbm %s350_s0, 128 }
   0x3   :  { %s16_s13 = sshll.u32 %s271_s12, 4  ;;  %p200_p0 = scmp.ne.s32.totalorder %s350_s0, %s199_s16  ;;  %s17_s13 = int_to_ptr.vmem [resolvable:$true] %s16_s13 }
   0x4   :  { %p203_p1 = scmp.lt.u32.totalorder %s199_s16, %s350_s0 }
   0x6   :  { %p205_p2 = pnand %p203_p1, %p200_p0 }
   0x8   :  { %208 = shalt.err (!%p205_p2)
}
   0x9   :  { %s209_s21 = scalar_lea.vmem %s17_s13, 128  ;;  %p214_p4 = scmp.lt.s32.totalorder %s17_s13, %s17_s13 }
   0xa   :  { %p210_p3 = scmp.ne.s32.totalorder %s17_s13, %s209_s21  ;;  %p215_p5 = scmp.lt.s32.totalorder %s209_s21, %s209_s21 }
   0xc   :  { %p216_p6 = por %p215_p5, %p214_p4 }
   0xe   :  { %p217_p7 = pnand %p216_p6, %p210_p3 }
  0x10   :  { %220 = shalt.err (!%p217_p7)
}
  0x11   :  { %s272_s22 = smov 64   ;;  %s273_s23 = smov 4  }
  0x12   :  { %22 = dma.hbm_to_vmem [thread:$0]  %s350_s0, 128, %s17_s13, [#allocation4], %s272_s22, %s272_s22, %s273_s23  }
  0x13   :  { %s274_s26 = smov [#allocation6]   ;;  %s221_s30 = scalar_lea.hbm %s351_s1, 256 }
  0x14   :  { %s28_s27 = sshll.u32 %s274_s26, 4  ;;  %p222_p8 = scmp.ne.s32.totalorder %s351_s1, %s221_s30  ;;  %s29_s27 = int_to_ptr.vmem [resolvable:$true] %s28_s27 }
  0x15   :  { %p225_p9 = scmp.lt.u32.totalorder %s221_s30, %s351_s1 }
  0x17   :  { %p227_p10 = pnand %p225_p9, %p222_p8 }
  0x19   :  { %230 = shalt.err (!%p227_p10)
}
  0x1a   :  { %s231_s8 = scalar_lea.vmem %s29_s27, 256  ;;  %p236_p12 = scmp.lt.s32.totalorder %s29_s27, %s29_s27 }
  0x1b   :  { %p232_p11 = scmp.ne.s32.totalorder %s29_s27, %s231_s8  ;;  %p237_p13 = scmp.lt.s32.totalorder %s231_s8, %s231_s8 }
  0x1d   :  { %p238_p0 = por %p237_p13, %p236_p12 }
  0x1f   :  { %p239_p1 = pnand %p238_p0, %p232_p11 }
  0x21   :  { %242 = shalt.err (!%p239_p1)
}
  0x22   :  { %34 = dma.hbm_to_vmem [thread:$0]  %s351_s1, 256, %s29_s27, [#allocation7], %s272_s22, %s272_s22, %s273_s23  }
  0x23   :  { %265 = dma.done.wait [#allocation4], 128  }
  0x24   :  { %266 = vsyncadd [#allocation4], 4294967168 }
  0x25   :  { %267 = dma.done.wait [#allocation7], 256  }
  0x26   :  { %268 = vsyncadd [#allocation7], 4294967040  ;;  %vm48_vm0 = vcmask 785408   ;;  %v275_v0 = vmov 0.0   ;;  %vm276_vm1 = vmmov 0   ;;  %v196_v1 = vld [vmem:[#allocation6] sm:$0xff]  }
  0x27   :  { %49 = vst.msk [vmem:[#allocation2] sm:$0xff] %vm48_vm0, %v275_v0  ;;  %50 = vst.msk [vmem:[#allocation2 + $0x8] sm:$0xff] %vm48_vm0, %v275_v0  ;;  %181 = vmatprep.subr.bf16.mxu0 %v275_v0  ;;  %185 = vmatprep.mubr.msk.bf16.mxu0 %vm276_vm1, %v275_v0  ;;  %v197_v2 = vld [vmem:[#allocation6 + $0x8] sm:$0xff]   ;;  %v198_v3 = vld [vmem:[#allocation3] sm:$0xff]   ;;  %vm76_vm2 = vcmask 261120   ;;  %vm148_vm3 = vcmask 781312  }
  0x28   :  { %182 = vmatpush3.bf16.msra.mxu0 %v196_v1  ;;  %v173_v12 = vld [vmem:[%s352_s2] ss:$0 sm:$0xff]  ;;  %s277_s11 = smov [#allocation8]  }
  0x29   :  { %183 = vmatprep.subr.bf16.mxu0 %v275_v0  ;;  %s156_s12 = sshll.u32 %s277_s11, 4  ;;  %s157_s12 = int_to_ptr.vmem [resolvable:$true] %s156_s12 }
  0x2a   :  { %s243_s13 = scalar_lea.vmem %s157_s12, 128  ;;  %p248_p3 = scmp.lt.s32.totalorder %s157_s12, %s157_s12 }
  0x2b   :  { %p244_p2 = scmp.ne.s32.totalorder %s157_s12, %s243_s13  ;;  %p249_p4 = scmp.lt.s32.totalorder %s243_s13, %s243_s13 }
  0x2c   :  { %184 = vmatpush3.bf16.msra.mxu0 %v197_v2 }
  0x2d   :  { %p250_p5 = por %p249_p4, %p248_p3 }
  0x2e   :  { %v51_v4 = vld [vmem:[#allocation2] sm:$0xff]  ;;  %v52_v6 = vld [vmem:[#allocation2 + $0x8] sm:$0xff] }
  0x2f   :  { %186 = vmatmul.mubr.msk.bf16.vlgmr.msra.gmra.mrb[0].mxu0 %vm76_vm2, %v198_v3  ;;  %p251_p6 = pnand %p250_p5, %p244_p2 }
 0x102   :  { %v114_v5 = vpop.f32.mrb[0].mxu0 }
 0x103   :  { %v121_v7 = vadd.f32 %v114_v5, %v51_v4  ;;  %v187_v8 = vpop.f32.mrb[1].mxu0 }
 0x104   :  { %v117_v9 = vpop.f32.mrb[2].mxu0 }
 0x105   :  { %124 = vst.msk [vmem:[#allocation2] sm:$0xff] %vm48_vm0, %v121_v7  ;;  %v122_v10 = vadd.f32 %v117_v9, %v52_v6  ;;  %v188_v11 = vpop.f32.mrb[3].mxu0 }
 0x107   :  { %125 = vst.msk [vmem:[#allocation2 + $0x8] sm:$0xff] %vm48_vm0, %v122_v10 }
 0x10c   :  { %v129_v13 = vld [vmem:[#allocation2] sm:$0xff] }
 0x10d   :  { %v138_v14 = vadd.f32 %v173_v12, %v129_v13 }
 0x10e   :  { %v130_v15 = vld [vmem:[#allocation2 + $0x8] sm:$0xff] }
 0x10f   :  { %v139_v16 = vadd.f32 %v173_v12, %v130_v15  ;;  %v176_v17 = vpack.c.bf16 %v138_v14, %v138_v14 }
 0x111   :  { %v177_v18 = vpack.c.bf16 %v139_v16, %v139_v16  ;;  %149 = vst.msk [vmem:[#allocation8] sm:$0xf] %vm148_vm3, %v176_v17 }
 0x113   :  { %150 = vst.msk [vmem:[#allocation8 + $0x4] sm:$0xf] %vm148_vm3, %v177_v18 }
 0x114   :  { %254 = shalt.err (!%p251_p6)
}
 0x115   :  { %s255_s15 = scalar_lea.hbm %s353_s3, 128 }
 0x116   :  { %p256_p7 = scmp.ne.s32.totalorder %s353_s3, %s255_s15  ;;  %p259_p8 = scmp.lt.u32.totalorder %s255_s15, %s353_s3 }
 0x118   :  { %p261_p9 = pnand %p259_p8, %p256_p7 }
 0x11a   :  { %264 = shalt.err (!%p261_p9)
}
 0x11b   :  { %162 = dma.vmem_to_hbm [thread:$0]  %s157_s12, 128, %s353_s3, [#allocation5], %s272_s22, %s272_s22, %s273_s23  }
 0x11c   :  { %269 = dma.done.wait [#allocation5], 128  }
 0x11d   :  { %270 = vsyncadd [#allocation5], 4294967168 }
 0x11e   :  { %166 = vsyncpa [#allocation4], 1 }
 0x11f   :  { %167 = vsyncpa [#allocation7], 1 }
 0x120   :  { %168 = vsyncpa [#allocation5], 1 }

</bundles_post_ra>
